<compile_context>
chip_gen: v6e
topology: v6e:2x2x1
jax: 0.10.0
libtpu: 0.0.40
codegen_flags: <defaults>
</compile_context>

<pallas_src>
import functools

import jax
import jax.numpy as jnp
from jax.experimental import pallas as pl
from jax.experimental.pallas import tpu as pltpu

LANES = 128
SUBLANES = 8


def _round_up(x, m):
    return ((x + m - 1) // m) * m


def _combined_loss_kernel(gen_ref, gt_ref, out_ref, acc_abs, acc_sq, *,
                          tile_rows, tiles_per_split, valid_rows, need_mask):
    """Grid: (core_split, row_tiles). Accumulate sum|d| and sum d^2 in one vreg each."""
    c = pl.program_id(0)   # split axis (2-way on v7x only)
    i = pl.program_id(1)   # reduction axis (last)

    @pl.when(i == 0)
    def _():
        acc_abs[...] = jnp.zeros_like(acc_abs)
        acc_sq[...] = jnp.zeros_like(acc_sq)

    d = gen_ref[...].astype(jnp.float32) - gt_ref[...].astype(jnp.float32)
    groups = tile_rows // SUBLANES

    def accumulate(dd):
        # Grouped partial reduce: (tile_rows,128) -> (groups,8,128) -> (8,128).
        # Pure VPU adds; accumulator stays a single vreg.
        d3 = dd.reshape(groups, SUBLANES, LANES)
        acc_abs[...] += jnp.sum(jnp.abs(d3), axis=0)
        acc_sq[...] += jnp.sum(d3 * d3, axis=0)

    if need_mask:
        row0 = (c * tiles_per_split + i) * tile_rows
        is_interior = row0 + tile_rows <= valid_rows

        @pl.when(is_interior)
        def _():
            accumulate(d)                      # fast path: no mask work

        @pl.when(jnp.logical_not(is_interior))
        def _():
            # Mask BEFORE abs/square so OOB garbage (even NaN) is selected away.
            row_idx = row0 + jax.lax.broadcasted_iota(jnp.int32, d.shape, 0)
            accumulate(jnp.where(row_idx < valid_rows, d, 0.0))
    else:
        accumulate(d)

    @pl.when(i == pl.num_programs(1) - 1)
    def _():
        abs_total = jnp.sum(acc_abs[...])      # single-vreg cross-lane reduce
        sq_total = jnp.sum(acc_sq[...])
        lane = jax.lax.broadcasted_iota(jnp.int32, out_ref.shape, 1)
        out_ref[...] = jnp.where(lane == 0, abs_total,
                                 jnp.where(lane == 1, sq_total, 0.0))


def _device_kind():
    try:
        return jax.devices()[0].device_kind.lower()
    except Exception:
        return ""


def combined_loss(generated_image, gt):
    """Returns (loss, lossL1, lossL2) matching the PyTorch module semantics."""
    assert generated_image.shape == gt.shape
    n_elems = int(generated_image.size)

    kind = _device_kind()
    is_v7x = ("7x" in kind) or ("v7" in kind)
    big_tiles = is_v7x or ("v6" in kind)
    # 8192 rows = 4 MiB f32 per input block (v6e/v7x, fits 32 MiB scoped VMEM
    # double-buffered); 4096 rows = 2 MiB elsewhere (fits v5e's 16 MiB default).
    target_tile_rows = 8192 if big_tiles else 4096

    # Flatten to a lane-dense 2D slab (reshape of a contiguous array is free).
    gen_flat = jnp.ravel(generated_image)
    gt_flat = jnp.ravel(gt)
    if n_elems % LANES != 0:
        # TODO(synk): rare ragged-tail path still pads (extra HBM copy); a
        # manual-DMA 1-D layout would be needed to avoid it entirely.
        pad = LANES - n_elems % LANES
        gen_flat = jnp.pad(gen_flat, (0, pad))
        gt_flat = jnp.pad(gt_flat, (0, pad))
    rows = gen_flat.size // LANES
    gen2d = gen_flat.reshape(rows, LANES)
    gt2d = gt_flat.reshape(rows, LANES)

    # Tile rows: big blocks for large inputs, otherwise the (8-rounded) full
    # extent. Always a multiple of 8 so the in-kernel grouped reduce is legal.
    tile_rows = (target_tile_rows if rows > target_tile_rows
                 else _round_up(rows, SUBLANES))
    tiles_total = -(-rows // tile_rows)

    # 2-way split only where there are two TensorCores to exploit (v7x).
    num_splits = 2 if (is_v7x and tiles_total >= 2) else 1
    tiles_per_split = -(-tiles_total // num_splits)
    clamp_idx = num_splits * tiles_per_split != tiles_total
    need_mask = (tiles_total * tile_rows != rows) or clamp_idx

    if clamp_idx:
        def in_index(c, i):
            # Keep the DMA in bounds; the edge-tile mask zeroes the
            # contribution of any duplicated / out-of-range block.
            return (jnp.minimum(c * tiles_per_split + i, tiles_total - 1), 0)
    else:
        def in_index(c, i):
            return (c * tiles_per_split + i, 0)

    kernel = functools.partial(
        _combined_loss_kernel,
        tile_rows=tile_rows,
        tiles_per_split=tiles_per_split,
        valid_rows=rows,
        need_mask=need_mask,
    )

    def run(dim_sems):
        return pl.pallas_call(
            kernel,
            out_shape=jax.ShapeDtypeStruct((num_splits, LANES), jnp.float32),
            grid_spec=pltpu.PrefetchScalarGridSpec(
                num_scalar_prefetch=0,
                grid=(num_splits, tiles_per_split),
                in_specs=[
                    pl.BlockSpec((tile_rows, LANES), in_index),
                    pl.BlockSpec((tile_rows, LANES), in_index),
                ],
                out_specs=pl.BlockSpec((1, LANES), lambda c, i: (c, 0)),
                scratch_shapes=[
                    pltpu.VMEM((SUBLANES, LANES), jnp.float32),
                    pltpu.VMEM((SUBLANES, LANES), jnp.float32),
                ],
            ),
            compiler_params=pltpu.CompilerParams(dimension_semantics=dim_sems),
        )(gen2d, gt2d)

    if num_splits == 2:
        # Guarantee a real per-TensorCore split on v7x; fall back to plain
        # "parallel" if CORE_PARALLEL is rejected by the lowering.
        try:
            partials = run((pltpu.CORE_PARALLEL, pltpu.ARBITRARY))
        except Exception:
            partials = run(("parallel", "arbitrary"))
    else:
        partials = run(("arbitrary", "arbitrary"))

    # Combine per-split partials (tiny) and normalize with an exact inv_n.
    abs_sum = jnp.sum(partials[:, 0])
    sq_sum = jnp.sum(partials[:, 1])
    inv_n = 1.0 / float(n_elems)
    loss_l1 = 0.1 * abs_sum * inv_n   # returned loss == self.lossL1 (0.1-scaled)
    loss_l2 = sq_sum * inv_n          # self.lossL2 (MSE)
    return loss_l1, loss_l1, loss_l2


if __name__ == "__main__":
    key = jax.random.PRNGKey(0)
    k1, k2 = jax.random.split(key)
    # NCHW like the PyTorch module's expected image tensors.
    B, C, H, W = 2, 4, 16, 16
    generated_image = jax.random.normal(k1, (B, C, H, W), dtype=jnp.float32)
    gt = jax.random.normal(k2, (B, C, H, W), dtype=jnp.float32)

    loss, loss_l1, loss_l2 = combined_loss(generated_image, gt)
    jax.block_until_ready((loss, loss_l1, loss_l2))

    # Pure-JAX reference check.
    ref_l1 = 0.1 * jnp.mean(jnp.abs(generated_image - gt))
    ref_l2 = jnp.mean((generated_image - gt) ** 2)
    assert jnp.allclose(loss, ref_l1, rtol=1e-5, atol=1e-6)
    assert jnp.allclose(loss_l1, ref_l1, rtol=1e-5, atol=1e-6)
    assert jnp.allclose(loss_l2, ref_l2, rtol=1e-5, atol=1e-6)

    print("KERNEL_OK")
</pallas_src>

<mosaic_0001>
module attributes {stable_mosaic.version = 11 : i64} {
  func.func @_combined_loss_kernel(%arg0: i32, %arg1: i32, %arg2: memref<16x128xf32, #tpu.memory_space<vmem>>, %arg3: memref<16x128xf32, #tpu.memory_space<vmem>>, %arg4: memref<1x128xf32, #tpu.memory_space<vmem>>, %arg5: memref<8x128xf32, #tpu.memory_space<vmem>>, %arg6: memref<8x128xf32, #tpu.memory_space<vmem>>) attributes {dimension_semantics = [#tpu.dimension_semantics<arbitrary>, #tpu.dimension_semantics<arbitrary>], iteration_bounds = array<i64: 1, 1>, scalar_prefetch = 0 : i64, scratch_operands = 2 : i64, tpu.core_type = #tpu.core_type<tc>, window_params = [{transform_indices = @transform_0, window_bounds = array<i64: 16, 128>}, {transform_indices = @transform_1, window_bounds = array<i64: 16, 128>}, {transform_indices = @transform_2, window_bounds = array<i64: 1, 128>}]} {
    %c0_i32 = arith.constant 0 : i32
    %0 = arith.cmpi eq, %arg1, %c0_i32 : i32
    %1 = arith.extui %0 : i1 to i32
    %c0_i32_0 = arith.constant 0 : i32
    %2 = arith.cmpi ne, %1, %c0_i32_0 : i32
    scf.if %2 {
      %cst_15 = arith.constant 0.000000e+00 : f32
      %20 = vector.broadcast %cst_15 : f32 to vector<8x128xf32>
      %c0_16 = arith.constant 0 : index
      %c0_17 = arith.constant 0 : index
      %21 = vector.load %arg5[%c0_16, %c0_17] : memref<8x128xf32, #tpu.memory_space<vmem>>, vector<8x128xf32>
      tpu.vector_store %arg5[%c0_16, %c0_17], %20 {strides = array<i32>} : memref<8x128xf32, #tpu.memory_space<vmem>>, vector<8x128xf32>,
      %cst_18 = arith.constant 0.000000e+00 : f32
      %22 = vector.broadcast %cst_18 : f32 to vector<8x128xf32>
      %c0_19 = arith.constant 0 : index
      %c0_20 = arith.constant 0 : index
      %23 = vector.load %arg6[%c0_19, %c0_20] : memref<8x128xf32, #tpu.memory_space<vmem>>, vector<8x128xf32>
      tpu.vector_store %arg6[%c0_19, %c0_20], %22 {strides = array<i32>} : memref<8x128xf32, #tpu.memory_space<vmem>>, vector<8x128xf32>,
    } else {
    }
    %c0 = arith.constant 0 : index
    %c0_1 = arith.constant 0 : index
    %3 = vector.load %arg2[%c0, %c0_1] : memref<16x128xf32, #tpu.memory_space<vmem>>, vector<16x128xf32>
    %c0_2 = arith.constant 0 : index
    %c0_3 = arith.constant 0 : index
    %4 = vector.load %arg3[%c0_2, %c0_3] : memref<16x128xf32, #tpu.memory_space<vmem>>, vector<16x128xf32>
    %5 = arith.subf %3, %4 : vector<16x128xf32>
    %6 = vector.shape_cast %5 : vector<16x128xf32> to vector<2x8x128xf32>
    %c0_4 = arith.constant 0 : index
    %c0_5 = arith.constant 0 : index
    %7 = vector.load %arg5[%c0_4, %c0_5] : memref<8x128xf32, #tpu.memory_space<vmem>>, vector<8x128xf32>
    %8 = math.absf %6 : vector<2x8x128xf32>
    %cst = arith.constant dense<0.000000e+00> : vector<8x128xf32>
    %9 = vector.multi_reduction <add>, %8, %cst [0] : vector<2x8x128xf32> to vector<8x128xf32>
    %10 = arith.addf %7, %9 : vector<8x128xf32>
    %c0_6 = arith.constant 0 : index
    %c0_7 = arith.constant 0 : index
    %11 = vector.load %arg5[%c0_6, %c0_7] : memref<8x128xf32, #tpu.memory_space<vmem>>, vector<8x128xf32>
    tpu.vector_store %arg5[%c0_6, %c0_7], %10 {strides = array<i32>} : memref<8x128xf32, #tpu.memory_space<vmem>>, vector<8x128xf32>,
    %c0_8 = arith.constant 0 : index
    %c0_9 = arith.constant 0 : index
    %12 = vector.load %arg6[%c0_8, %c0_9] : memref<8x128xf32, #tpu.memory_space<vmem>>, vector<8x128xf32>
    %13 = arith.mulf %6, %6 : vector<2x8x128xf32>
    %cst_10 = arith.constant dense<0.000000e+00> : vector<8x128xf32>
    %14 = vector.multi_reduction <add>, %13, %cst_10 [0] : vector<2x8x128xf32> to vector<8x128xf32>
    %15 = arith.addf %12, %14 : vector<8x128xf32>
    %c0_11 = arith.constant 0 : index
    %c0_12 = arith.constant 0 : index
    %16 = vector.load %arg6[%c0_11, %c0_12] : memref<8x128xf32, #tpu.memory_space<vmem>>, vector<8x128xf32>
    tpu.vector_store %arg6[%c0_11, %c0_12], %15 {strides = array<i32>} : memref<8x128xf32, #tpu.memory_space<vmem>>, vector<8x128xf32>,
    %c0_i32_13 = arith.constant 0 : i32
    %17 = arith.cmpi eq, %arg1, %c0_i32_13 : i32
    %18 = arith.extui %17 : i1 to i32
    %c0_i32_14 = arith.constant 0 : i32
    %19 = arith.cmpi ne, %18, %c0_i32_14 : i32
    scf.if %19 {
      %c0_15 = arith.constant 0 : index
      %c0_16 = arith.constant 0 : index
      %20 = vector.load %arg5[%c0_15, %c0_16] : memref<8x128xf32, #tpu.memory_space<vmem>>, vector<8x128xf32>
      %21 = vector.shape_cast %20 : vector<8x128xf32> to vector<1x8x128xf32>
      %cst_17 = arith.constant dense<0.000000e+00> : vector<1xf32>
      %22 = vector.multi_reduction <add>, %21, %cst_17 [1, 2] : vector<1x8x128xf32> to vector<1xf32>
      %23 = vector.shape_cast %22 : vector<1xf32> to vector<1x1x1xf32>
      %24 = vector.extract %23[0, 0, 0] : f32 from vector<1x1x1xf32>
      %c0_18 = arith.constant 0 : index
      %c0_19 = arith.constant 0 : index
      %25 = vector.load %arg6[%c0_18, %c0_19] : memref<8x128xf32, #tpu.memory_space<vmem>>, vector<8x128xf32>
      %26 = vector.shape_cast %25 : vector<8x128xf32> to vector<1x8x128xf32>
      %cst_20 = arith.constant dense<0.000000e+00> : vector<1xf32>
      %27 = vector.multi_reduction <add>, %26, %cst_20 [1, 2] : vector<1x8x128xf32> to vector<1xf32>
      %28 = vector.shape_cast %27 : vector<1xf32> to vector<1x1x1xf32>
      %29 = vector.extract %28[0, 0, 0] : f32 from vector<1x1x1xf32>
      %30 = tpu.iota {dimensions = array<i32: 1>} : vector<1x128xi32>
      %c0_i32_21 = arith.constant 0 : i32
      %31 = vector.broadcast %c0_i32_21 : i32 to vector<1x128xi32>
      %32 = arith.cmpi eq, %30, %31 : vector<1x128xi32>
      %c1_i32 = arith.constant 1 : i32
      %33 = vector.broadcast %c1_i32 : i32 to vector<1x128xi32>
      %34 = arith.cmpi eq, %30, %33 : vector<1x128xi32>
      %cst_22 = arith.constant 0.000000e+00 : f32
      %35 = vector.broadcast %29 : f32 to vector<1x128xf32>
      %36 = vector.broadcast %cst_22 : f32 to vector<1x128xf32>
      %37 = arith.select %34, %35, %36 : vector<1x128xi1>, vector<1x128xf32>
      %38 = vector.broadcast %24 : f32 to vector<1x128xf32>
      %39 = arith.select %32, %38, %37 : vector<1x128xi1>, vector<1x128xf32>
      %c0_23 = arith.constant 0 : index
      %c0_24 = arith.constant 0 : index
      %40 = vector.load %arg4[%c0_23, %c0_24] : memref<1x128xf32, #tpu.memory_space<vmem>>, vector<1x128xf32>
      tpu.vector_store %arg4[%c0_23, %c0_24], %39 {strides = array<i32>} : memref<1x128xf32, #tpu.memory_space<vmem>>, vector<1x128xf32>,
    } else {
    }
    return
  }
  func.func @transform_0(%arg0: i32, %arg1: i32) -> (i32, i32) {
    %c1_i32 = arith.constant 1 : i32
    %0 = arith.muli %arg0, %c1_i32 : i32
    %1 = arith.addi %0, %arg1 : i32
    %c0_i32 = arith.constant 0 : i32
    %c0_i32_0 = arith.constant 0 : i32
    return %1, %c0_i32 : i32, i32
  }
  func.func @transform_1(%arg0: i32, %arg1: i32) -> (i32, i32) {
    %c1_i32 = arith.constant 1 : i32
    %0 = arith.muli %arg0, %c1_i32 : i32
    %1 = arith.addi %0, %arg1 : i32
    %c0_i32 = arith.constant 0 : i32
    %c0_i32_0 = arith.constant 0 : i32
    return %1, %c0_i32 : i32, i32
  }
  func.func @transform_2(%arg0: i32, %arg1: i32) -> (i32, i32) {
    %c0_i32 = arith.constant 0 : i32
    %c0_i32_0 = arith.constant 0 : i32
    return %arg0, %c0_i32 : i32, i32
  }
}

</mosaic_0001>

<bundles_post_ra>
// kernel: tpu_custom_call.1
= control target key start
LH: loop header
LB: loop body
LE: loop exit
PB: predicated region body
PF: predicated region fallthrough
CT: control target
= control target key end

     0   :  { %7 = vsyncpa [#allocation5], 0  ;;  %s228_s0 = inlined_call_operand.hbm [shape: f32[16,128], index: 0, kind: input, shape index: {}]   ;;  %s229_s1 = inlined_call_operand.hbm [shape: f32[16,128], index: 1, kind: input, shape index: {}]   ;;  %s230_s2 = inlined_call_operand.hbm [shape: f32[1,128], index: 2, kind: output, shape index: {}]  }
   0x1   :  { %8 = vsyncpa [#allocation8], 0 }
   0x2   :  { %9 = vsyncpa [#allocation6], 0  ;;  %s199_s9 = smov [#allocation4]  }
   0x3   :  { %s19_s10 = sshll.u32 %s199_s9, 4  ;;  %s20_s10 = int_to_ptr.vmem [resolvable:$true] %s19_s10 }
   0x4   :  { %s141_s11 = scalar_lea.vmem %s20_s10, 256  ;;  %p146_p1 = scmp.lt.s32.totalorder %s20_s10, %s20_s10 }
   0x5   :  { %p142_p0 = scmp.ne.s32.totalorder %s20_s10, %s141_s11  ;;  %p147_p2 = scmp.lt.s32.totalorder %s141_s11, %s141_s11 }
   0x7   :  { %p148_p3 = por %p147_p2, %p146_p1 }
   0x9   :  { %p149_p4 = pnand %p148_p3, %p142_p0 }
   0xb   :  { %152 = shalt.err (!%p149_p4)
}
   0xc   :  { %s200_s12 = smov 128   ;;  %s201_s13 = smov 8  }
   0xd   :  { %25 = dma.hbm_to_vmem [thread:$0]  %s228_s0, 256, %s20_s10, [#allocation5], %s200_s12, %s200_s12, %s201_s13  }
   0xe   :  { %s202_s16 = smov [#allocation7]  }
   0xf   :  { %s35_s17 = sshll.u32 %s202_s16, 4  ;;  %s36_s17 = int_to_ptr.vmem [resolvable:$true] %s35_s17 }
  0x10   :  { %s161_s18 = scalar_lea.vmem %s36_s17, 256  ;;  %p166_p6 = scmp.lt.s32.totalorder %s36_s17, %s36_s17 }
  0x11   :  { %p162_p5 = scmp.ne.s32.totalorder %s36_s17, %s161_s18  ;;  %p167_p7 = scmp.lt.s32.totalorder %s161_s18, %s161_s18 }
  0x13   :  { %p168_p8 = por %p167_p7, %p166_p6 }
  0x15   :  { %p169_p9 = pnand %p168_p8, %p162_p5 }
  0x17   :  { %172 = shalt.err (!%p169_p9)
}
  0x18   :  { %41 = dma.hbm_to_vmem [thread:$0]  %s229_s1, 256, %s36_s17, [#allocation8], %s200_s12, %s200_s12, %s201_s13  }
  0x19   :  { %193 = dma.done.wait [#allocation5], 256  }
  0x1a   :  { %194 = vsyncadd [#allocation5], 4294967040 }
  0x1b   :  { %195 = dma.done.wait [#allocation8], 256  }
  0x1c   :  { %196 = vsyncadd [#allocation8], 4294967040  ;;  %v58_v0 = vld [vmem:[#allocation4] sm:$0xff]  ;;  %v59_v1 = vld [vmem:[#allocation4 + $0x8] sm:$0xff]  ;;  %v99_v26 = vlaneseq  ;;  %s203_s1 = smov [#allocation9]  }
  0x1d   :  { %v60_v2 = vld [vmem:[#allocation7] sm:$0xff]  ;;  %v61_v3 = vld [vmem:[#allocation7 + $0x8] sm:$0xff]  ;;  %s114_s21 = sshll.u32 %s203_s1, 4  ;;  %s115_s21 = int_to_ptr.vmem [resolvable:$true] %s114_s21 }
  0x1e   :  { %v62_v4 = vsub.f32 %v58_v0, %v60_v2  ;;  %v63_v5 = vsub.f32 %v59_v1, %v61_v3  ;;  %v100_v27 = vand.u32 127, %v99_v26  ;;  %s173_s23 = scalar_lea.vmem %s115_s21, 16  ;;  %s177_s24 = scalar_lea.vmem %s115_s21, 32 }
  0x1f   :  { %p174_p10 = scmp.ne.s32.totalorder %s115_s21, %s173_s23  ;;  %p178_p11 = scmp.lt.s32.totalorder %s115_s21, %s115_s21 }
  0x20   :  { %v65_v6 = vand.u32 2147483647, %v62_v4  ;;  %v66_v7 = vand.u32 2147483647, %v63_v5  ;;  %v71_v8 = vmul.f32 %v62_v4, %v62_v4  ;;  %v72_v9 = vmul.f32 %v63_v5, %v63_v5  ;;  %p179_p12 = scmp.lt.s32.totalorder %s177_s24, %s173_s23 }
  0x21   :  { %vm102_vm0 = vcmp.eq.s32.totalorder %v100_v27, 1  ;;  %vm101_vm1 = vcmp.eq.s32.totalorder %v100_v27, 0 }
  0x22   :  { %v67_v10 = vadd.f32 %v66_v7, %v65_v6  ;;  %v73_v11 = vadd.f32 %v72_v9, %v71_v8  ;;  %p180_p13 = por %p179_p12, %p178_p11 }
  0x24   :  { %80 = vadd.xlane.f32.xlu0 %v67_v10  ;;  %p181_p0 = pnand %p180_p13, %p174_p10 }
  0x28   :  { %90 = vadd.xlane.f32.xlu0 %v73_v11 }
  0xad   :  { %v81_v12 = vpop.xlane.xlu0 %80 }
  0xae   :  { %v82_v13 = vrot.slane %v81_v12, 4 }
  0xb0   :  { %v83_v14 = vadd.f32 %v82_v13, %v81_v12 }
  0xb1   :  { %v91_v15 = vpop.xlane.xlu0 %90 }
  0xb2   :  { %v84_v16 = vrot.slane %v83_v14, 2  ;;  %v92_v17 = vrot.slane %v91_v15, 4 }
  0xb4   :  { %v93_v18 = vadd.f32 %v92_v17, %v91_v15  ;;  %v85_v19 = vadd.f32 %v84_v16, %v83_v14 }
  0xb6   :  { %v94_v20 = vrot.slane %v93_v18, 2  ;;  %v86_v21 = vrot.slane %v85_v19, 1 }
  0xb8   :  { %v95_v22 = vadd.f32 %v94_v20, %v93_v18  ;;  %v87_v23 = vadd.f32 %v86_v21, %v85_v19 }
  0xba   :  { %124 = vpush %v87_v23  ;;  %v96_v24 = vrot.slane %v95_v22, 1 }
  0xbc   :  { %v97_v25 = vadd.f32 %v96_v24, %v95_v22 }
  0xbe   :  { %126 = vpush %v97_v25 }
  0xeb   :  { %s125_s0 = spop %124 }
  0xec   :  { %v105_v29 = vstv %s125_s0 }
  0xef   :  { %s127_s22 = spop %126 }
  0xf0   :  { %v103_v28 = vstv %s127_s22 }
  0xf1   :  { %v104_v30 = vsel %vm102_vm0, %v103_v28, 0.0 }
  0xf2   :  { %v106_v31 = vsel %vm101_vm1, %v105_v29, %v104_v30 }
  0xf3   :  { %107 = vst [vmem:[#allocation9] sm:$0x1] %v106_v31 }
  0xf4   :  { %184 = shalt.err (!%p181_p0)
}
  0xf5   :  { %117 = dma.vmem_to_hbm [thread:$0]  %s115_s21, 16, %s230_s2, [#allocation6]  }
  0xf6   :  { %197 = dma.done.wait [#allocation6], 16  }
  0xf7   :  { %198 = vsyncadd [#allocation6], 4294967280 }
  0xf8   :  { %121 = vsyncpa [#allocation5], 1 }
  0xf9   :  { %122 = vsyncpa [#allocation8], 1 }
  0xfa   :  { %123 = vsyncpa [#allocation6], 1 }

</bundles_post_ra>
